<compile_context>
chip_gen: v5e
topology: v5e:2x2
jax: 0.10.0
libtpu: 0.0.40
codegen_flags: <defaults>
</compile_context>

<pallas_src>
import jax
import jax.numpy as jnp
from jax.experimental import pallas as pl
from jax.experimental.pallas import tpu as pltpu


def _round_up(n, m):
    return ((n + m - 1) // m) * m


def _cdiv(a, b):
    return (a + b - 1) // b


def wordle_nn_kernel(x_ref, w1_ref, w2_ref, bias_ref, o_ref):
    hid = w1_ref.shape[1]
    out_w = o_ref.shape[1]
    # fc1: cast the streamed x tile to the weight compute dtype (no-op for
    # f32, free VPU cast for bf16), MXU matmul with f32 accumulation; bias-add
    # and ReLU stay in f32 on the VPU (v5e-safe).
    xv = x_ref[...].astype(w1_ref.dtype)
    h = jnp.dot(xv, w1_ref[...], preferred_element_type=jnp.float32)
    h = jnp.maximum(h + bias_ref[0:1, 0:hid], 0.0)
    # fc2: cast activation back to the weight dtype for the MXU.
    out = jnp.dot(h.astype(w2_ref.dtype), w2_ref[...],
                  preferred_element_type=jnp.float32)
    o_ref[...] = (out + bias_ref[1:2, 0:out_w]).astype(o_ref.dtype)


def prepare_wordle_nn_params(w1, b1, w2, b2, *, compute_dtype=jnp.bfloat16):
    """One-time weight layout (hoisted out of the per-call path).

    w1: [hidden, in_dim]  (PyTorch nn.Linear layout), b1: [hidden]
    w2: [out_dim, hidden],                             b2: [out_dim]
    Returns (w1_p [in,hid], w2_p [hid,out], bias [2, max(hid,out)] f32).
    """
    hidden, in_dim = w1.shape
    out_dim = w2.shape[0]
    w1_p = jnp.asarray(w1.T, dtype=compute_dtype)        # [in_dim, hidden]
    w2_p = jnp.asarray(w2.T, dtype=compute_dtype)        # [hidden, out_dim]
    # Both biases packed into one small f32 argument -> single tiny DMA.
    bmax = max(hidden, out_dim)
    bias = jnp.zeros((2, bmax), jnp.float32)
    bias = bias.at[0, :hidden].set(jnp.asarray(b1, jnp.float32))
    bias = bias.at[1, :out_dim].set(jnp.asarray(b2, jnp.float32))
    return w1_p, w2_p, bias


def wordle_nn_forward(x, params, *, tile_b=512):
    """Forward pass: relu(x @ w1.T + b1) @ w2.T + b2.

    x      : [B, in_dim] (f32 or bf16 — pass bf16 to halve the x DMA bytes)
    params : output of prepare_wordle_nn_params (reused across calls)
    Returns [B, out_dim] float32.
    """
    w1_p, w2_p, bias = params
    B, in_dim = x.shape
    assert w1_p.shape[0] == in_dim
    hidden = w1_p.shape[1]
    out_dim = w2_p.shape[1]

    # Batch tile: multiple of 8 sublanes, capped so the grid has >= 2 steps
    # whenever B > 8 (dimension_semantics=("parallel",) then shards the batch
    # across both TensorCores on v7x). Ragged last block handled by Pallas.
    half = _round_up(max(_cdiv(B, 2), 1), 8)
    tile = max(8, min(_round_up(tile_b, 8), half))
    grid = (_cdiv(B, tile),)

    w_itemsize = jnp.dtype(w1_p.dtype).itemsize
    cost = pl.CostEstimate(
        flops=2 * B * (in_dim * hidden + hidden * out_dim),
        transcendentals=0,
        bytes_accessed=(x.size * x.dtype.itemsize
                        + (w1_p.size + w2_p.size) * w_itemsize
                        + bias.size * 4
                        + B * out_dim * 4),
    )

    return pl.pallas_call(
        wordle_nn_kernel,
        out_shape=jax.ShapeDtypeStruct((B, out_dim), jnp.float32),
        grid_spec=pl.GridSpec(
            grid=grid,
            in_specs=[
                # x tiles stream over the batch axis, unpadded
                # (last dim == full array dim is legal).
                pl.BlockSpec((tile, in_dim), lambda i: (i, 0)),
                # Weights / packed bias: constant block index -> fetched once,
                # VMEM-resident across all grid steps.
                pl.BlockSpec(w1_p.shape, lambda i: (0, 0)),
                pl.BlockSpec(w2_p.shape, lambda i: (0, 0)),
                pl.BlockSpec(bias.shape, lambda i: (0, 0)),
            ],
            # Output written unpadded (out_dim lanes == full array dim).
            out_specs=pl.BlockSpec((tile, out_dim), lambda i: (i, 0)),
        ),
        compiler_params=pltpu.CompilerParams(
            dimension_semantics=("parallel",),
        ),
        cost_estimate=cost,
    )(x, w1_p, w2_p, bias)


def reference_forward(x, w1, b1, w2, b2):
    h = jnp.maximum(x @ w1.T + b1, 0.0)
    return h @ w2.T + b2


if __name__ == "__main__":
    # Small shapes consistent with the module: hidden is fixed at 128 by the
    # module; batch=8, input_size=64, output_size=32.
    B, IN, HID, OUT = 8, 64, 128, 32

    key = jax.random.PRNGKey(0)
    k_x, k_w1, k_b1, k_w2, k_b2, k_x2 = jax.random.split(key, 6)

    x = jax.random.normal(k_x, (B, IN), dtype=jnp.float32)
    # PyTorch-like uniform(-1/sqrt(fan_in), 1/sqrt(fan_in)) init, PyTorch layout.
    bound1 = 1.0 / jnp.sqrt(jnp.float32(IN))
    w1 = jax.random.uniform(k_w1, (HID, IN), jnp.float32, -bound1, bound1)
    b1 = jax.random.uniform(k_b1, (HID,), jnp.float32, -bound1, bound1)
    bound2 = 1.0 / jnp.sqrt(jnp.float32(HID))
    w2 = jax.random.uniform(k_w2, (OUT, HID), jnp.float32, -bound2, bound2)
    b2 = jax.random.uniform(k_b2, (OUT,), jnp.float32, -bound2, bound2)

    ref = reference_forward(x, w1, b1, w2, b2)

    # 1) f32 path, single grid step, tight tolerance.
    params_f32 = prepare_wordle_nn_params(w1, b1, w2, b2,
                                          compute_dtype=jnp.float32)
    out = wordle_nn_forward(x, params_f32)
    jax.block_until_ready(out)
    assert out.shape == (B, OUT)
    assert jnp.allclose(out, ref, atol=1e-5, rtol=1e-5)

    # 2) Multi-step batch grid with a ragged last block (200 = 3*64 + 8),
    #    reusing the same prepared params (no per-call preprocessing).
    B2 = 200
    x2 = jax.random.normal(k_x2, (B2, IN), dtype=jnp.float32)
    out2 = wordle_nn_forward(x2, params_f32, tile_b=64)
    jax.block_until_ready(out2)
    ref2 = reference_forward(x2, w1, b1, w2, b2)
    assert out2.shape == (B2, OUT)
    assert jnp.allclose(out2, ref2, atol=1e-5, rtol=1e-5)

    # 3) Default bf16 streaming path (bf16 x + bf16 weights, f32 MXU accum),
    #    2 "parallel" grid steps -> both TCs on v7x.
    params_bf16 = prepare_wordle_nn_params(w1, b1, w2, b2)
    out3 = wordle_nn_forward(x2.astype(jnp.bfloat16), params_bf16)
    jax.block_until_ready(out3)
    assert out3.shape == (B2, OUT)
    assert jnp.allclose(out3, ref2, atol=5e-2, rtol=5e-2)

    print("KERNEL_OK")
</pallas_src>

<mosaic_0001>
module attributes {stable_mosaic.version = 11 : i64} {
  func.func @wordle_nn_kernel(%arg0: i32, %arg1: memref<8x64xf32, #tpu.memory_space<vmem>>, %arg2: memref<64x128xf32, #tpu.memory_space<vmem>>, %arg3: memref<128x32xf32, #tpu.memory_space<vmem>>, %arg4: memref<2x128xf32, #tpu.memory_space<vmem>>, %arg5: memref<8x32xf32, #tpu.memory_space<vmem>>) attributes {dimension_semantics = [#tpu.dimension_semantics<parallel>], iteration_bounds = array<i64: 1>, scalar_prefetch = 0 : i64, scratch_operands = 0 : i64, tpu.core_type = #tpu.core_type<tc>, window_params = [{transform_indices = @transform_0, window_bounds = array<i64: 8, 64>}, {pipeline_mode = #tpu.pipeline_mode<synchronous>, transform_indices = @transform_1, window_bounds = array<i64: 64, 128>}, {pipeline_mode = #tpu.pipeline_mode<synchronous>, transform_indices = @transform_2, window_bounds = array<i64: 128, 32>}, {pipeline_mode = #tpu.pipeline_mode<synchronous>, transform_indices = @transform_3, window_bounds = array<i64: 2, 128>}, {transform_indices = @transform_4, window_bounds = array<i64: 8, 32>}]} {
    %c0 = arith.constant 0 : index
    %c0_0 = arith.constant 0 : index
    %0 = vector.load %arg1[%c0, %c0_0] : memref<8x64xf32, #tpu.memory_space<vmem>>, vector<8x64xf32>
    %c0_1 = arith.constant 0 : index
    %c0_2 = arith.constant 0 : index
    %1 = vector.load %arg2[%c0_1, %c0_2] : memref<64x128xf32, #tpu.memory_space<vmem>>, vector<64x128xf32>
    %cst = arith.constant dense<0.000000e+00> : vector<8x128xf32>
    %2 = tpu.matmul %0, %1, %cst {dimension_numbers = #tpu.dot_dimension_numbers<[1], [0], [0], [1], [0, 0, 1, 1], [], []>} : vector<8x64xf32>, vector<64x128xf32>, vector<8x128xf32> -> vector<8x128xf32>
    %c0_3 = arith.constant 0 : index
    %c0_4 = arith.constant 0 : index
    %3 = vector.load %arg4[%c0_3, %c0_4] : memref<2x128xf32, #tpu.memory_space<vmem>>, vector<1x128xf32>
    %4 = vector.broadcast %3 : vector<1x128xf32> to vector<8x128xf32>
    %5 = arith.addf %2, %4 : vector<8x128xf32>
    %cst_5 = arith.constant 0.000000e+00 : f32
    %6 = vector.broadcast %cst_5 : f32 to vector<8x128xf32>
    %7 = arith.maximumf %5, %6 : vector<8x128xf32>
    %c0_6 = arith.constant 0 : index
    %c0_7 = arith.constant 0 : index
    %8 = vector.load %arg3[%c0_6, %c0_7] : memref<128x32xf32, #tpu.memory_space<vmem>>, vector<128x32xf32>
    %cst_8 = arith.constant dense<0.000000e+00> : vector<8x32xf32>
    %9 = tpu.matmul %7, %8, %cst_8 {dimension_numbers = #tpu.dot_dimension_numbers<[1], [0], [0], [1], [0, 0, 1, 1], [], []>} : vector<8x128xf32>, vector<128x32xf32>, vector<8x32xf32> -> vector<8x32xf32>
    %c1 = arith.constant 1 : index
    %c0_9 = arith.constant 0 : index
    %10 = vector.load %arg4[%c1, %c0_9] : memref<2x128xf32, #tpu.memory_space<vmem>>, vector<1x32xf32>
    %11 = vector.broadcast %10 : vector<1x32xf32> to vector<8x32xf32>
    %12 = arith.addf %9, %11 : vector<8x32xf32>
    %c0_10 = arith.constant 0 : index
    %c0_11 = arith.constant 0 : index
    %13 = vector.load %arg5[%c0_10, %c0_11] : memref<8x32xf32, #tpu.memory_space<vmem>>, vector<8x32xf32>
    tpu.vector_store %arg5[%c0_10, %c0_11], %12 {strides = array<i32>} : memref<8x32xf32, #tpu.memory_space<vmem>>, vector<8x32xf32>,
    return
  }
  func.func @transform_0(%arg0: i32) -> (i32, i32) {
    %c0_i32 = arith.constant 0 : i32
    %c0_i32_0 = arith.constant 0 : i32
    return %arg0, %c0_i32 : i32, i32
  }
  func.func @transform_1(%arg0: i32) -> (i32, i32) {
    %c0_i32 = arith.constant 0 : i32
    %c0_i32_0 = arith.constant 0 : i32
    %c0_i32_1 = arith.constant 0 : i32
    return %c0_i32, %c0_i32_0 : i32, i32
  }
  func.func @transform_2(%arg0: i32) -> (i32, i32) {
    %c0_i32 = arith.constant 0 : i32
    %c0_i32_0 = arith.constant 0 : i32
    %c0_i32_1 = arith.constant 0 : i32
    return %c0_i32, %c0_i32_0 : i32, i32
  }
  func.func @transform_3(%arg0: i32) -> (i32, i32) {
    %c0_i32 = arith.constant 0 : i32
    %c0_i32_0 = arith.constant 0 : i32
    %c0_i32_1 = arith.constant 0 : i32
    return %c0_i32, %c0_i32_0 : i32, i32
  }
  func.func @transform_4(%arg0: i32) -> (i32, i32) {
    %c0_i32 = arith.constant 0 : i32
    %c0_i32_0 = arith.constant 0 : i32
    return %arg0, %c0_i32 : i32, i32
  }
}

</mosaic_0001>

<bundles_post_ra>
// kernel: tpu_custom_call.1
= control target key start
LH: loop header
LB: loop body
LE: loop exit
PB: predicated region body
PF: predicated region fallthrough
CT: control target
= control target key end

     0   :  { %s250_s0 = inlined_call_operand.vmem [shape: f32[8,64], index: 0, kind: input, shape index: {}]   ;;  %s251_s1 = inlined_call_operand.vmem [shape: f32[64,128], index: 1, kind: input, shape index: {}]   ;;  %s252_s2 = inlined_call_operand.vmem [shape: f32[128,32], index: 2, kind: input, shape index: {}]   ;;  %s253_s3 = inlined_call_operand.vmem [shape: f32[2,128], index: 3, kind: input, shape index: {}]   ;;  %s254_s4 = inlined_call_operand.hbm [shape: f32[8,32], index: 4, kind: output, shape index: {}]  }
   0x1   :  { %v26_v0 = vld [vmem:[%s251_s1 + $0x38] sm:$0xff]  ;;  %v25_v1 = vld [vmem:[%s251_s1 + $0x30] sm:$0xff]  ;;  %v24_v2 = vld [vmem:[%s251_s1 + $0x28] sm:$0xff] }
   0x2   :  { %41 = vmatpush.msra.mxu0 %v26_v0  ;;  %v69_v3 = vld [vmem:[%s252_s2 + $0x78] sm:$0xff]  ;;  %v68_v4 = vld [vmem:[%s252_s2 + $0x70] sm:$0xff]  ;;  %v23_v5 = vld [vmem:[%s251_s1 + $0x20] sm:$0xff] }
   0x3   :  { %72 = vmatpush.msra.mxu1 %v69_v3  ;;  %v67_v6 = vld [vmem:[%s252_s2 + $0x68] sm:$0xff]  ;;  %v22_v7 = vld [vmem:[%s251_s1 + $0x18] sm:$0xff]  ;;  %v66_v8 = vld [vmem:[%s252_s2 + $0x60] sm:$0xff] }
   0x4   :  { %42 = vmatpush.msra.mxu0 %v25_v1  ;;  %v21_v9 = vld [vmem:[%s251_s1 + $0x10] sm:$0xff] }
   0x5   :  { %73 = vmatpush.msra.mxu1 %v68_v4 }
   0x6   :  { %43 = vmatpush.msra.mxu0 %v24_v2 }
   0x7   :  { %74 = vmatpush.msra.mxu1 %v67_v6 }
   0x8   :  { %44 = vmatpush.msra.mxu0 %v23_v5 }
   0x9   :  { %9 = vsyncpa [#allocation3], 0  ;;  %v65_v10 = vld [vmem:[%s252_s2 + $0x58] sm:$0xff]  ;;  %v20_v11 = vld [vmem:[%s251_s1 + $0x8] sm:$0xff]  ;;  %75 = vmatpush.msra.mxu1 %v66_v8  ;;  %vm29_vm0 = vcmask 523264   ;;  %s140_s15 = smov [#allocation2]  }
   0xa   :  { %45 = vmatpush.msra.mxu0 %v22_v7  ;;  %v64_v12 = vld [vmem:[%s252_s2 + $0x50] sm:$0xff]  ;;  %v19_v13 = vld [vmem:[%s251_s1] sm:$0xff]  ;;  %v63_v15 = vld [vmem:[%s252_s2 + $0x48] sm:$0xff]  ;;  %s99_s16 = sshll.u32 %s140_s15, 4  ;;  %s101_s19 = sshll.u32 %s254_s4, 4  ;;  %vm92_vm1 = vcmask 261120   ;;  %s100_s16 = int_to_ptr.vmem [resolvable:$true] %s99_s16  ;;  %s102_s19 = int_to_ptr.hbm [resolvable:$true] %s101_s19 }
   0xb   :  { %76 = vmatpush.msra.mxu1 %v65_v10  ;;  %v18_v14 = vld [vmem:[%s250_s0] sm:$0xff]  ;;  %v61_v17 = vld [vmem:[%s252_s2 + $0x38] sm:$0xff]  ;;  %v60_v18 = vld [vmem:[%s252_s2 + $0x30] sm:$0xff] }
   0xc   :  { %46 = vmatpush.msra.mxu0 %v21_v9  ;;  %v62_v16 = vld [vmem:[%s252_s2 + $0x40] sm:$0xff]  ;;  %v59_v19 = vld [vmem:[%s252_s2 + $0x28] sm:$0xff]  ;;  %v57_v21 = vld [vmem:[%s252_s2 + $0x18] sm:$0xff] }
   0xd   :  { %77 = vmatpush.msra.mxu1 %v64_v12  ;;  %v58_v20 = vld [vmem:[%s252_s2 + $0x20] sm:$0xff]  ;;  %v56_v22 = vld [vmem:[%s252_s2 + $0x10] sm:$0xff]  ;;  %v55_v23 = vld [vmem:[%s252_s2 + $0x8] sm:$0xff] }
   0xe   :  { %47 = vmatpush.msra.mxu0 %v20_v11  ;;  %v54_v24 = vld [vmem:[%s252_s2] sm:$0xff] }
   0xf   :  { %78 = vmatpush.msra.mxu1 %v63_v15  ;;  %v112_v25 = vld [vmem:[%s253_s3] ss:$0 sm:$0xff]  ;;  %v113_v29 = vld [vmem:[%s253_s3 + $0x1] ss:$0 sm:$0xff] }
  0x10   :  { %48 = vmatpush.msra.mxu0 %v19_v13 }
  0x11   :  { %110 = vmatmul.msk.f32.vlgmr.msra.gmra.mxu0 %vm29_vm0, %v18_v14  ;;  %79 = vmatpush.msra.mxu1 %v62_v16 }
  0x13   :  { %80 = vmatpush.msra.mxu1 %v61_v17 }
  0x15   :  { %81 = vmatpush.msra.mxu1 %v60_v18 }
  0x17   :  { %82 = vmatpush.msra.mxu1 %v59_v19 }
  0x19   :  { %83 = vmatpush.msra.mxu1 %v58_v20 }
  0x1b   :  { %84 = vmatpush.msra.mxu1 %v57_v21 }
  0x1d   :  { %85 = vmatpush.msra.mxu1 %v56_v22 }
  0x1f   :  { %86 = vmatpush.msra.mxu1 %v55_v23 }
  0x21   :  { %87 = vmatpush.msra.mxu1 %v54_v24 }
  0x8e   :  { %v50_v26 = vpop.f32.mrf.mxu0 }
  0x8f   :  { %v51_v27 = vadd.f32 %v112_v25, %v50_v26 }
  0x91   :  { %v53_v28 = vmax.f32 %v51_v27, 0.0 }
  0x93   :  { %88 = vmatmul.f32.vlgmr.msra.gmra.mxu1 %v53_v28 }
 0x110   :  { %v89_v30 = vpop.f32.mrf.mxu1 }
 0x111   :  { %v90_v31 = vadd.f32 %v113_v29, %v89_v30 }
 0x113   :  { %93 = vst.msk [vmem:[#allocation2] sm:$0xff] %vm92_vm1, %v90_v31 }
 0x114   :  { %104 = dma.vmem_to_hbm [thread:$0]  %s100_s16, 128, %s102_s19, [#allocation3]  }
 0x115   :  { %138 = dma.done.wait [#allocation3], 128  }
 0x116   :  { %139 = vsyncadd [#allocation3], 4294967168 }
 0x117   :  { %109 = vsyncpa [#allocation3], 1 }

</bundles_post_ra>
